<compile_context>
chip_gen: v7x
topology: tpu7x:2x2x1
jax: 0.10.0
libtpu: 0.0.40
codegen_flags: <defaults>
</compile_context>

<pallas_src>
import jax
import jax.numpy as jnp
from jax.experimental import pallas as pl
from jax.experimental.pallas import tpu as pltpu


def fixed_hidden_mlp_kernel(x_ref, slab_ref, out_ref):
    d = x_ref.shape[-1]                       # 20

    x = x_ref[...]                            # (B, d)  float32
    plane0 = slab_ref[0]                      # (d+1, d): rows 0..d-1 = W.T @ R, row d = b @ R + 1
    plane1 = slab_ref[1]                      # (d+1, d): rows 0..d-1 = W.T,     row d = b

    m1, b1 = plane0[:d, :], plane0[d:, :]
    wt, b2 = plane1[:d, :], plane1[d:, :]

    # h = relu((X @ W.T + b) @ R + 1)  ==  relu(X @ (W.T @ R) + (b @ R + 1))
    h = jnp.maximum(jnp.dot(x, m1, preferred_element_type=jnp.float32) + b1, 0.0)
    # h = self.linear(h)
    h = jnp.dot(h, wt, preferred_element_type=jnp.float32) + b2

    abs_sum = jnp.sum(jnp.abs(h), keepdims=True)   # (1, 1)
    total = jnp.sum(h, keepdims=True)              # (1, 1)

    # "while abs_sum > 1: h /= 2" in closed form.
    # For abs_sum = m * 2**e with m in [1, 2): n = e halvings, plus one more if m > 1.
    bits = pltpu.bitcast(abs_sum, jnp.int32)
    exponent = ((bits >> 23) & 0xFF) - 127
    mant_nonzero = (bits & 0x7FFFFF) != 0
    n = jnp.where(abs_sum > 1.0, exponent + mant_nonzero.astype(jnp.int32), 0)
    # scale = 2**-n, built exactly from the exponent field (valid for 0 <= n <= 126,
    # far beyond what these magnitudes produce).
    scale = pltpu.bitcast((127 - n) << 23, jnp.float32)

    # TODO(synk): the per-iteration `print('X.abs().sum() =', ...)` side effect has
    # no Pallas equivalent; omitted.
    # NOTE: if abs_sum were +inf the PyTorch loop never terminates; the closed form
    # returns a finite value instead.  Not reachable with these inputs.

    # return h.sum()   (sum scales exactly by 2**-n, same as halving the tensor n times)
    out_ref[0, 0] = (total * scale)[0, 0]


def fixed_hidden_mlp(x, linear_w, linear_b, rand_weight):
    # Static-weight folding in the wrapper (free under jit; weights are constants).
    w_t = linear_w.T                                   # (in, out) — kernel never transposes
    m1 = w_t @ rand_weight                             # fused  W.T @ R
    b1 = linear_b @ rand_weight + 1.0                  # fused  b @ R + 1
    plane0 = jnp.concatenate([m1, b1[None, :]], axis=0)         # (21, 20)
    plane1 = jnp.concatenate([w_t, linear_b[None, :]], axis=0)  # (21, 20)
    slab = jnp.stack([plane0, plane1], axis=0).astype(jnp.float32)  # (2, 21, 20)

    out = pl.pallas_call(
        fixed_hidden_mlp_kernel,
        out_shape=jax.ShapeDtypeStruct((1, 1), jnp.float32),
        in_specs=[
            pl.BlockSpec(memory_space=pltpu.MemorySpace.VMEM),   # X
            pl.BlockSpec(memory_space=pltpu.MemorySpace.VMEM),   # packed constants
        ],
        out_specs=pl.BlockSpec(memory_space=pltpu.MemorySpace.SMEM),
    )(x.astype(jnp.float32), slab)
    return out[0, 0]


def reference(x, linear_w, linear_b, rand_weight):
    h = x @ linear_w.T + linear_b
    h = jnp.maximum(h @ rand_weight + 1.0, 0.0)
    h = h @ linear_w.T + linear_b

    def cond(h):
        return jnp.sum(jnp.abs(h)) > 1.0

    def body(h):
        return h / 2.0

    h = jax.lax.while_loop(cond, body, h)
    return jnp.sum(h)


if __name__ == "__main__":
    key = jax.random.PRNGKey(0)
    k_x, k_rw, k_w, k_b = jax.random.split(key, 4)

    # X = torch.rand(2, 20)
    x = jax.random.uniform(k_x, (2, 20), dtype=jnp.float32)
    # self.rand_weight = torch.rand((20, 20))
    rand_weight = jax.random.uniform(k_rw, (20, 20), dtype=jnp.float32)
    # nn.Linear(20, 20) default init: U(-1/sqrt(20), 1/sqrt(20))
    bound = 1.0 / jnp.sqrt(20.0)
    linear_w = jax.random.uniform(k_w, (20, 20), dtype=jnp.float32,
                                  minval=-bound, maxval=bound)
    linear_b = jax.random.uniform(k_b, (20,), dtype=jnp.float32,
                                  minval=-bound, maxval=bound)

    out = fixed_hidden_mlp(x, linear_w, linear_b, rand_weight)
    out = jax.block_until_ready(out)

    ref = reference(x, linear_w, linear_b, rand_weight)
    # rtol slightly relaxed vs 1e-5: the W.T@R fold reassociates one matmul.
    assert jnp.allclose(out, ref, rtol=1e-4, atol=1e-5), (out, ref)

    print("KERNEL_OK")
</pallas_src>

<mosaic_0001>
module attributes {stable_mosaic.version = 11 : i64} {
  func.func @fixed_hidden_mlp_kernel(%arg0: memref<2x20xf32, #tpu.memory_space<vmem>>, %arg1: memref<2x21x20xf32, #tpu.memory_space<vmem>>, %arg2: memref<1x1xf32, #tpu.memory_space<smem>>) attributes {dimension_semantics = [], scalar_prefetch = 0 : i64, scratch_operands = 0 : i64, tpu.core_type = #tpu.core_type<tc>} {
    %c0 = arith.constant 0 : index
    %c0_0 = arith.constant 0 : index
    %0 = vector.load %arg0[%c0, %c0_0] : memref<2x20xf32, #tpu.memory_space<vmem>>, vector<2x20xf32>
    %c0_1 = arith.constant 0 : index
    %c0_2 = arith.constant 0 : index
    %c0_3 = arith.constant 0 : index
    %1 = vector.load %arg1[%c0_1, %c0_2, %c0_3] : memref<2x21x20xf32, #tpu.memory_space<vmem>>, vector<1x21x20xf32>
    %2 = vector.shape_cast %1 : vector<1x21x20xf32> to vector<21x20xf32>
    %c1 = arith.constant 1 : index
    %c0_4 = arith.constant 0 : index
    %c0_5 = arith.constant 0 : index
    %3 = vector.load %arg1[%c1, %c0_4, %c0_5] : memref<2x21x20xf32, #tpu.memory_space<vmem>>, vector<1x21x20xf32>
    %4 = vector.shape_cast %3 : vector<1x21x20xf32> to vector<21x20xf32>
    %5 = vector.extract_strided_slice %2 {offsets = [0, 0], sizes = [20, 20], strides = [1, 1]} : vector<21x20xf32> to vector<20x20xf32>
    %6 = vector.extract_strided_slice %2 {offsets = [20, 0], sizes = [1, 20], strides = [1, 1]} : vector<21x20xf32> to vector<1x20xf32>
    %7 = vector.extract_strided_slice %4 {offsets = [0, 0], sizes = [20, 20], strides = [1, 1]} : vector<21x20xf32> to vector<20x20xf32>
    %8 = vector.extract_strided_slice %4 {offsets = [20, 0], sizes = [1, 20], strides = [1, 1]} : vector<21x20xf32> to vector<1x20xf32>
    %cst = arith.constant dense<0.000000e+00> : vector<2x20xf32>
    %9 = tpu.matmul %0, %5, %cst {dimension_numbers = #tpu.dot_dimension_numbers<[1], [0], [0], [1], [0, 0, 1, 1], [], []>} : vector<2x20xf32>, vector<20x20xf32>, vector<2x20xf32> -> vector<2x20xf32>
    %10 = vector.broadcast %6 : vector<1x20xf32> to vector<2x20xf32>
    %11 = arith.addf %9, %10 : vector<2x20xf32>
    %cst_6 = arith.constant 0.000000e+00 : f32
    %12 = vector.broadcast %cst_6 : f32 to vector<2x20xf32>
    %13 = arith.maximumf %11, %12 : vector<2x20xf32>
    %cst_7 = arith.constant dense<0.000000e+00> : vector<2x20xf32>
    %14 = tpu.matmul %13, %7, %cst_7 {dimension_numbers = #tpu.dot_dimension_numbers<[1], [0], [0], [1], [0, 0, 1, 1], [], []>} : vector<2x20xf32>, vector<20x20xf32>, vector<2x20xf32> -> vector<2x20xf32>
    %15 = vector.broadcast %8 : vector<1x20xf32> to vector<2x20xf32>
    %16 = arith.addf %14, %15 : vector<2x20xf32>
    %17 = math.absf %16 : vector<2x20xf32>
    %18 = vector.shape_cast %17 : vector<2x20xf32> to vector<1x2x20xf32>
    %cst_8 = arith.constant dense<0.000000e+00> : vector<1xf32>
    %19 = vector.multi_reduction <add>, %18, %cst_8 [1, 2] : vector<1x2x20xf32> to vector<1xf32>
    %20 = vector.shape_cast %19 : vector<1xf32> to vector<1x1x1xf32>
    %21 = vector.extract %20[0, 0, 0] : f32 from vector<1x1x1xf32>
    %22 = vector.broadcast %21 : f32 to vector<1x1xf32>
    %23 = vector.shape_cast %16 : vector<2x20xf32> to vector<1x2x20xf32>
    %cst_9 = arith.constant dense<0.000000e+00> : vector<1xf32>
    %24 = vector.multi_reduction <add>, %23, %cst_9 [1, 2] : vector<1x2x20xf32> to vector<1xf32>
    %25 = vector.shape_cast %24 : vector<1xf32> to vector<1x1x1xf32>
    %26 = vector.extract %25[0, 0, 0] : f32 from vector<1x1x1xf32>
    %27 = vector.broadcast %26 : f32 to vector<1x1xf32>
    %28 = tpu.bitcast %22 : vector<1x1xf32> -> vector<1x1xi32>
    %c23_i32 = arith.constant 23 : i32
    %29 = vector.broadcast %c23_i32 : i32 to vector<1x1xi32>
    %30 = arith.shrsi %28, %29 : vector<1x1xi32>
    %c255_i32 = arith.constant 255 : i32
    %31 = vector.broadcast %c255_i32 : i32 to vector<1x1xi32>
    %32 = arith.andi %30, %31 : vector<1x1xi32>
    %c127_i32 = arith.constant 127 : i32
    %33 = vector.broadcast %c127_i32 : i32 to vector<1x1xi32>
    %34 = arith.subi %32, %33 : vector<1x1xi32>
    %c8388607_i32 = arith.constant 8388607 : i32
    %35 = vector.broadcast %c8388607_i32 : i32 to vector<1x1xi32>
    %36 = arith.andi %28, %35 : vector<1x1xi32>
    %c0_i32 = arith.constant 0 : i32
    %37 = vector.broadcast %c0_i32 : i32 to vector<1x1xi32>
    %38 = arith.cmpi ne, %36, %37 : vector<1x1xi32>
    %cst_10 = arith.constant 1.000000e+00 : f32
    %39 = vector.broadcast %cst_10 : f32 to vector<1x1xf32>
    %40 = arith.cmpf ogt, %22, %39 : vector<1x1xf32>
    %41 = arith.extui %38 : vector<1x1xi1> to vector<1x1xi32>
    %42 = arith.addi %34, %41 : vector<1x1xi32>
    %c0_i32_11 = arith.constant 0 : i32
    %43 = vector.broadcast %c0_i32_11 : i32 to vector<1x1xi32>
    %44 = arith.select %40, %42, %43 : vector<1x1xi1>, vector<1x1xi32>
    %c127_i32_12 = arith.constant 127 : i32
    %45 = vector.broadcast %c127_i32_12 : i32 to vector<1x1xi32>
    %46 = arith.subi %45, %44 : vector<1x1xi32>
    %c23_i32_13 = arith.constant 23 : i32
    %47 = vector.broadcast %c23_i32_13 : i32 to vector<1x1xi32>
    %48 = arith.shli %46, %47 : vector<1x1xi32>
    %49 = tpu.bitcast %48 : vector<1x1xi32> -> vector<1x1xf32>
    %50 = arith.mulf %27, %49 : vector<1x1xf32>
    %51 = vector.extract %50[0, 0] : f32 from vector<1x1xf32>
    %c0_14 = arith.constant 0 : index
    %c0_15 = arith.constant 0 : index
    %52 = memref.load %arg2[%c0_14, %c0_15] : memref<1x1xf32, #tpu.memory_space<smem>>
    memref.store %51, %arg2[%c0_14, %c0_15] : memref<1x1xf32, #tpu.memory_space<smem>>
    return
  }
}

</mosaic_0001>

<bundles_post_ra>
// kernel: tpu_custom_call.1
= control target key start
LH: loop header
LB: loop body
LE: loop exit
PB: predicated region body
PF: predicated region fallthrough
CT: control target
= control target key end

     0   :  { %v300_v2 = vmov 0.0|0.0   ;;  %vm301_vm0 = vmmov 0   ;;  %v302_v4 = vmov 0.0   ;;  %s355_s0 = inlined_call_operand.vmem [shape: f32[2,20], index: 0, kind: input, shape index: {}]   ;;  %s356_s1 = inlined_call_operand.vmem [shape: f32[2,21,20], index: 1, kind: input, shape index: {}]   ;;  %s357_s2 = inlined_call_operand.hbm [shape: f32[1,1], index: 2, kind: output, shape index: {}]  }
   0x1   :  { %v13_v0 = vld [vmem:[%s356_s1] sm:$0xff]  ;;  %v14_v1 = vld [vmem:[%s356_s1 + $0x8] sm:$0xff]  ;;  %271 = vmatprep.subr.bf16.mxu0 %v300_v2  ;;  %274 = vmatprep.subr.bf16.mxu1 %v300_v2 }
   0x2   :  { %v272_v3 = vpack.c.bf16 %v14_v1, %v13_v0  ;;  %259 = vmatprep.mubr.msk.f32.mxu0 %vm301_vm0, %v302_v4  ;;  %268 = vmatprep.mubr.msk.f32.mxu1 %vm301_vm0, %v302_v4 }
   0x3   :  { %7 = vsyncpa [#allocation3], 0  ;;  %v15_v5 = vld [vmem:[%s356_s1 + $0x10] sm:$0x1f]  ;;  %vm28_vm1 = vcmask 1043456   ;;  %vm24_vm2 = vcmask 162816   ;;  %v20_v11 = vlaneseq }
   0x4   :  { %273 = vmatpush3.bf16.msra.mxu0 %v272_v3  ;;  %v12_v6 = vld [vmem:[%s355_s0] sm:$0x3]  ;;  %v237_v7 = vld [vmem:[%s356_s1 + $0x18] sm:$0xff]  ;;  %v239_v10 = vld [vmem:[%s356_s1 + $0x28] sm:$0x1f]  ;;  %vm184_vm3 = vcmask 156672  }
   0x5   :  { %257 = vmatprep.subr.mxu0 %v302_v4  ;;  %v238_v8 = vld [vmem:[%s356_s1 + $0x20] sm:$0xff]  ;;  %v21_v12 = vshrl.u32 %v20_v11, 7  ;;  %v303_v45 = vmov 0   ;;  %s288_s26 = scalar_lea.hbm %s357_s2, 16 }
   0x6   :  { %v275_v9 = vpack.c.bf16 %v238_v8, %v237_v7  ;;  %p289_p0 = scmp.ne.s32.totalorder %s357_s2, %s288_s26  ;;  %p292_p1 = scmp.lt.u32.totalorder %s288_s26, %s357_s2 }
   0x7   :  { %v22_v13 = vsub.s32 4, %v21_v12 }
   0x8   :  { %258 = vmatpush3.msk.msra.mxu0 %vm28_vm1, %v15_v5  ;;  %276 = vmatpush3.bf16.msra.mxu1 %v275_v9  ;;  %p294_p2 = pnand %p292_p1, %p289_p0 }
   0x9   :  { %260 = vmatmul.mubr.msk.f32.vlgmr.msra.gmra.mrb[0].mxu0 %vm24_vm2, %v12_v6  ;;  %266 = vmatprep.subr.mxu1 %v302_v4  ;;  %v23_v14 = vrot.slane %v15_v5, %v22_v13  ;;  %v106_v19 = vrot.slane %v239_v10, %v22_v13 }
   0xc   :  { %267 = vmatpush3.msk.msra.mxu1 %vm28_vm1, %v239_v10 }
  0xdc   :  { %v98_v15 = vpop.f32.mrb[0].mxu0 }
  0xdd   :  { %v99_v16 = vadd.f32 %v98_v15, %v23_v14  ;;  %v261_v17 = vpop.f32.mrb[1].mxu0 }
  0xdf   :  { %v102_v18 = vmax.f32 %v99_v16, 0.0 }
  0xe1   :  { %269 = vmatmul.mubr.msk.f32.vlgmr.msra.gmra.mrb[0].mxu1 %vm24_vm2, %v102_v18 }
 0x1b4   :  { %v179_v20 = vpop.f32.mrb[0].mxu1 }
 0x1b5   :  { %v180_v21 = vadd.f32 %v179_v20, %v106_v19  ;;  %v270_v22 = vpop.f32.mrb[1].mxu1 }
 0x1b7   :  { %v183_v23 = vand.u32 2147483647, %v180_v21  ;;  %v196_v25 = vsel %vm184_vm3, %v180_v21, 0.0 }
 0x1b9   :  { %v185_v24 = vsel %vm184_vm3, %v183_v23, 0.0 }
 0x1ba   :  { %186 = vadd.xlane.f32.xlu0 %v185_v24 }
 0x1be   :  { %197 = vadd.xlane.f32.xlu0 %v196_v25 }
 0x247   :  { %v187_v26 = vpop.xlane.xlu0 %186 }
 0x248   :  { %v188_v27 = vrot.slane %v187_v26, 4 }
 0x24a   :  { %v189_v28 = vadd.f32 %v188_v27, %v187_v26 }
 0x24b   :  { %v198_v29 = vpop.xlane.xlu0 %197 }
 0x24c   :  { %v190_v30 = vrot.slane %v189_v28, 2  ;;  %v199_v31 = vrot.slane %v198_v29, 4 }
 0x24e   :  { %v200_v32 = vadd.f32 %v199_v31, %v198_v29  ;;  %v191_v33 = vadd.f32 %v190_v30, %v189_v28 }
 0x250   :  { %v201_v34 = vrot.slane %v200_v32, 2  ;;  %v192_v35 = vrot.slane %v191_v33, 1 }
 0x252   :  { %v202_v36 = vadd.f32 %v201_v34, %v200_v32  ;;  %v193_v37 = vadd.f32 %v192_v35, %v191_v33 }
 0x254   :  { %277 = vpush %v193_v37  ;;  %v203_v38 = vrot.slane %v202_v36, 1 }
 0x256   :  { %v204_v39 = vadd.f32 %v203_v38, %v202_v36 }
 0x258   :  { %279 = vpush %v204_v39 }
 0x285   :  { %s278_s0 = spop %277 }
 0x286   :  { %v195_v40 = vstv %s278_s0 }
 0x287   :  { %v208_v41 = vshra.s32 %v195_v40, 23  ;;  %v211_v42 = vand.u32 8388607, %v195_v40  ;;  %vm213_vm5 = vcmp.gt.f32.partialorder %v195_v40, 1.0 }
 0x289   :  { %v209_v43 = vand.u32 255, %v208_v41  ;;  %vm212_vm4 = vcmp.ne.s32.totalorder %v211_v42, 0  ;;  %s280_s1 = spop %279 }
 0x28a   :  { %v214_v46 = vsel %vm212_vm4, 1, %v303_v45  ;;  %v206_v51 = vstv %s280_s1 }
 0x28b   :  { %v244_v44 = vadd.s32 4294967169, %v209_v43 }
 0x28d   :  { %v215_v47 = vadd.s32 %v244_v44, %v214_v46 }
 0x28f   :  { %v216_v48 = vsel %vm213_vm5, %v215_v47, 0 }
 0x290   :  { %v217_v49 = vsub.s32 127, %v216_v48 }
 0x292   :  { %v218_v50 = vshll.u32 %v217_v49, 23 }
 0x294   :  { %v220_v52 = vmul.f32 %v218_v50, %v206_v51 }
 0x296   :  { %281 = vpush %v220_v52 }
 0x2c7   :  { %s282_s23 = spop %281 }
 0x2c8   :  { %223 = sst [smem:[#allocation2]] %s282_s23 }
 0x2c9   :  { %297 = shalt.err (!%p294_p2)
}
 0x2ca   :  { %s304_s3 = smov [#allocation2]  }
 0x2cb   :  { %231 = dma.smem_to_hbm %s304_s3, 16, %s357_s2, [#allocation3]  }
 0x2cc   :  { %298 = dma.done.wait [#allocation3], 16  }
 0x2cd   :  { %299 = vsyncadd [#allocation3], 4294967280 }
 0x2ce   :  { %235 = sfence }
 0x2cf   :  { %236 = vsyncpa [#allocation3], 1 }

</bundles_post_ra>
